<compile_context>
chip_gen: v6e
topology: v6e:2x2x1
jax: 0.10.0
libtpu: 0.0.40
codegen_flags: <defaults>
</compile_context>

<pallas_src>
import math
import functools

import jax
import jax.numpy as jnp
from jax.experimental import pallas as pl
from jax.experimental.pallas import tpu as pltpu


def _attention_kernel(*refs, inv_scale, dropout_p, matmul_dtype):
    """One (batch*head, q-tile) step.

    refs = (q_ref, k_ref, v_ref, [mask_ref,] o_ref, p_ref)
      q_ref    : (1, TQ, D)   VMEM
      k_ref    : (1, S,  D)   VMEM
      v_ref    : (1, S,  D)   VMEM
      mask_ref : (1, TQ, S)   VMEM uint8 keep-mask (only if dropout_p > 0)
      o_ref    : (1, TQ, D)   VMEM
      p_ref    : (1, TQ, S)   VMEM
    """
    if dropout_p > 0.0:
        q_ref, k_ref, v_ref, mask_ref, o_ref, p_ref = refs
    else:
        q_ref, k_ref, v_ref, o_ref, p_ref = refs
        mask_ref = None

    # Fold 1/scale (a compile-time constant) into Q: one (TQ, D) multiply
    # instead of a (TQ, S) divide of the score matrix.
    q = (q_ref[0].astype(jnp.float32) * inv_scale).astype(matmul_dtype)
    k = k_ref[0].astype(matmul_dtype)
    v = v_ref[0]

    # scores = q @ k^T without materializing a transpose: contract D of both.
    scores = jax.lax.dot_general(
        q, k,
        dimension_numbers=(((1,), (1,)), ((), ())),
        preferred_element_type=jnp.float32)              # (TQ, S), f32 acc

    # Numerically-stable softmax over the last dim (torch.Softmax(dim=-1)).
    # Elementwise math in f32; EXACT division (approx reciprocal failed the
    # accuracy check in the previous version).
    m = jnp.max(scores, axis=-1, keepdims=True)
    e = jnp.exp(scores - m)
    denom = jnp.sum(e, axis=-1, keepdims=True)
    probs = e / denom                                     # rows sum to 1

    # Dropout (train-mode nn.Dropout: drop w.p. p, scale kept by 1/(1-p)).
    if dropout_p > 0.0:
        keep = mask_ref[0] != 0
        probs = jnp.where(keep, probs * (1.0 / (1.0 - dropout_p)), 0.0)

    # output = probs @ v  (optionally bf16 operands, always f32 accumulate).
    out = jnp.dot(probs.astype(matmul_dtype), v.astype(matmul_dtype),
                  preferred_element_type=jnp.float32)

    o_ref[0] = out.astype(o_ref.dtype)
    p_ref[0] = probs.astype(p_ref.dtype)


def _pick_q_tile(s, cap, align):
    """Largest q-tile that divides s, is a multiple of `align`, and <= cap."""
    if s <= cap:
        return s
    t = (cap // align) * align
    while t >= align:
        if s % t == 0:
            return t
        t -= align
    # TODO(synk): pad S up to a tile multiple and mask the tail instead of
    # falling back to one full-length tile for awkward (e.g. prime) S.
    return s


def compute_attention(query, key, value, scale, *, dropout_p=0.0, seed=0,
                      block_q=256, matmul_dtype=None, probs_dtype=None):
    """Pallas equivalent of ComputeAttention.forward.

    query/key/value: (B, H, S, D).  Returns (output, dropout_qk) with shapes
    (B, H, S, D) and (B, H, S, S).
    """
    B, H, S, D = query.shape
    BH = B * H

    matmul_dtype = jnp.dtype(query.dtype if matmul_dtype is None else matmul_dtype)
    probs_dtype = jnp.dtype(query.dtype if probs_dtype is None else probs_dtype)

    q = query.reshape(BH, S, D)
    k = key.reshape(BH, S, D)
    v = value.reshape(BH, S, D)

    has_dropout = float(dropout_p) > 0.0

    # The q-tile touches blocks of several dtypes; make it a legal sublane
    # multiple for all of them (32-bit: 8, 16-bit: 16, 8-bit mask: 32).
    align = max(32 // query.dtype.itemsize,
                32 // probs_dtype.itemsize,
                32 if has_dropout else 8)
    TQ = _pick_q_tile(S, block_q, align)
    num_q_tiles = S // TQ

    kernel = functools.partial(
        _attention_kernel,
        inv_scale=1.0 / float(scale),
        dropout_p=float(dropout_p),
        matmul_dtype=matmul_dtype)

    in_specs = [
        pl.BlockSpec((1, TQ, D), lambda i, j: (i, j, 0)),   # q tile
        pl.BlockSpec((1, S, D), lambda i, j: (i, 0, 0)),    # k (full seq)
        pl.BlockSpec((1, S, D), lambda i, j: (i, 0, 0)),    # v (full seq)
    ]
    inputs = [q, k, v]

    if has_dropout:
        # uint8 keep-mask generated once outside the kernel (4x less HBM read
        # than f32 uniforms).  See TODO(synk) at top re: in-kernel PRNG.
        keep = jax.random.bernoulli(jax.random.PRNGKey(seed),
                                    1.0 - float(dropout_p), (BH, S, S))
        inputs.append(keep.astype(jnp.uint8))
        in_specs.append(pl.BlockSpec((1, TQ, S), lambda i, j: (i, j, 0)))

    out_specs = [
        pl.BlockSpec((1, TQ, D), lambda i, j: (i, j, 0)),   # output
        pl.BlockSpec((1, TQ, S), lambda i, j: (i, j, 0)),   # dropout_qk
    ]

    # Scoped-VMEM budget: double-buffered blocks + f32 softmax temporaries.
    itm = query.dtype.itemsize
    est = 2 * (TQ * D * itm            # q (double-buffered)
               + 2 * S * D * itm       # k + v
               + TQ * D * itm          # output
               + TQ * S * probs_dtype.itemsize)
    if has_dropout:
        est += 2 * TQ * S
    est += 4 * TQ * S * 4              # scores / exp / probs temps + slack
    try:
        vmem_cap = pltpu.get_tpu_info().vmem_capacity_bytes
    except Exception:
        vmem_cap = 128 * 1024 * 1024
    vmem_limit = int(min(max(est, 32 * 1024 * 1024), int(0.9 * vmem_cap)))

    out_flat, probs_flat = pl.pallas_call(
        kernel,
        grid=(BH, num_q_tiles),
        in_specs=in_specs,
        out_specs=out_specs,
        out_shape=(
            jax.ShapeDtypeStruct((BH, S, D), query.dtype),
            jax.ShapeDtypeStruct((BH, S, S), probs_dtype),
        ),
        compiler_params=pltpu.CompilerParams(
            dimension_semantics=("parallel", "parallel"),
            vmem_limit_bytes=vmem_limit),
    )(*inputs)

    return out_flat.reshape(B, H, S, D), probs_flat.reshape(B, H, S, S)


def _reference(query, key, value, scale):
    qk = jnp.einsum("bhqd,bhkd->bhqk", query, key,
                    precision=jax.lax.Precision.HIGHEST) / scale
    p = jax.nn.softmax(qk, axis=-1)
    out = jnp.einsum("bhqk,bhkd->bhqd", p, value,
                     precision=jax.lax.Precision.HIGHEST)
    return out, p


if __name__ == "__main__":
    B, H, S, D = 2, 2, 8, 32
    root = jax.random.PRNGKey(0)
    kq, kk, kv = jax.random.split(root, 3)

    query = jax.random.normal(kq, (B, H, S, D), dtype=jnp.float32)
    key = jax.random.normal(kk, (B, H, S, D), dtype=jnp.float32)
    value = jax.random.normal(kv, (B, H, S, D), dtype=jnp.float32)
    scale = float(math.sqrt(D))

    # 1) No-dropout, exact (input-dtype MXU) path vs. pure-JAX reference.
    out0, p0 = compute_attention(query, key, value, scale, dropout_p=0.0)
    jax.block_until_ready((out0, p0))
    ref_out, ref_p = _reference(query, key, value, scale)
    assert jnp.allclose(out0, ref_out, atol=1e-3, rtol=1e-3), "output mismatch"
    assert jnp.allclose(p0, ref_p, atol=1e-3, rtol=1e-3), "probs mismatch"
    assert jnp.allclose(jnp.sum(p0, axis=-1), 1.0, atol=1e-3), "rows != 1"

    # 2) bf16-MXU / bf16-probs fast path (f32 accumulation) — loose check.
    out_bf, p_bf = compute_attention(query, key, value, scale, dropout_p=0.0,
                                     matmul_dtype=jnp.bfloat16,
                                     probs_dtype=jnp.bfloat16)
    jax.block_until_ready((out_bf, p_bf))
    assert p_bf.dtype == jnp.bfloat16
    assert jnp.allclose(out_bf.astype(jnp.float32), ref_out,
                        atol=7e-2, rtol=7e-2), "bf16 path diverged"

    # 3) Dropout path (train-mode semantics of nn.Dropout).
    out_d, p_d = compute_attention(query, key, value, scale,
                                   dropout_p=0.1, seed=0)
    jax.block_until_ready((out_d, p_d))
    assert out_d.shape == (B, H, S, D)
    assert p_d.shape == (B, H, S, S)
    # Consistency with the module: output == dropout_qk @ value.
    recon = jnp.einsum("bhqk,bhkd->bhqd", p_d, value,
                       precision=jax.lax.Precision.HIGHEST)
    assert jnp.allclose(out_d, recon, atol=2e-3, rtol=2e-3), "out != p @ v"

    print("KERNEL_OK")
</pallas_src>

<mosaic_0001>
module attributes {stable_mosaic.version = 11 : i64} {
  func.func @_attention_kernel(%arg0: i32, %arg1: i32, %arg2: memref<1x8x32xf32, #tpu.memory_space<vmem>>, %arg3: memref<1x8x32xf32, #tpu.memory_space<vmem>>, %arg4: memref<1x8x32xf32, #tpu.memory_space<vmem>>, %arg5: memref<1x8x32xf32, #tpu.memory_space<vmem>>, %arg6: memref<1x8x8xf32, #tpu.memory_space<vmem>>) attributes {dimension_semantics = [#tpu.dimension_semantics<parallel>, #tpu.dimension_semantics<parallel>], iteration_bounds = array<i64: 4, 1>, scalar_prefetch = 0 : i64, scratch_operands = 0 : i64, tpu.core_type = #tpu.core_type<tc>, window_params = [{transform_indices = @transform_0, window_bounds = array<i64: 1, 8, 32>}, {transform_indices = @transform_1, window_bounds = array<i64: 1, 8, 32>}, {transform_indices = @transform_2, window_bounds = array<i64: 1, 8, 32>}, {transform_indices = @transform_3, window_bounds = array<i64: 1, 8, 32>}, {transform_indices = @transform_4, window_bounds = array<i64: 1, 8, 8>}]} {
    %c0 = arith.constant 0 : index
    %c0_0 = arith.constant 0 : index
    %c0_1 = arith.constant 0 : index
    %0 = vector.load %arg2[%c0, %c0_0, %c0_1] : memref<1x8x32xf32, #tpu.memory_space<vmem>>, vector<1x8x32xf32>
    %1 = vector.shape_cast %0 : vector<1x8x32xf32> to vector<8x32xf32>
    %cst = arith.constant 0.176776692 : f32
    %2 = vector.broadcast %cst : f32 to vector<8x32xf32>
    %3 = arith.mulf %1, %2 : vector<8x32xf32>
    %c0_2 = arith.constant 0 : index
    %c0_3 = arith.constant 0 : index
    %c0_4 = arith.constant 0 : index
    %4 = vector.load %arg3[%c0_2, %c0_3, %c0_4] : memref<1x8x32xf32, #tpu.memory_space<vmem>>, vector<1x8x32xf32>
    %5 = vector.shape_cast %4 : vector<1x8x32xf32> to vector<8x32xf32>
    %c0_5 = arith.constant 0 : index
    %c0_6 = arith.constant 0 : index
    %c0_7 = arith.constant 0 : index
    %6 = vector.load %arg4[%c0_5, %c0_6, %c0_7] : memref<1x8x32xf32, #tpu.memory_space<vmem>>, vector<1x8x32xf32>
    %7 = vector.shape_cast %6 : vector<1x8x32xf32> to vector<8x32xf32>
    %cst_8 = arith.constant dense<0.000000e+00> : vector<8x8xf32>
    %8 = tpu.matmul %3, %5, %cst_8 {dimension_numbers = #tpu.dot_dimension_numbers<[1], [1], [0], [0], [0, 0, 1, 0], [], []>} : vector<8x32xf32>, vector<8x32xf32>, vector<8x8xf32> -> vector<8x8xf32>
    %cst_9 = arith.constant dense<0xFF800000> : vector<8xf32>
    %9 = vector.multi_reduction <maximumf>, %8, %cst_9 [1] : vector<8x8xf32> to vector<8xf32>
    %10 = vector.shape_cast %9 : vector<8xf32> to vector<8x1xf32>
    %11 = vector.broadcast %10 : vector<8x1xf32> to vector<8x8xf32>
    %12 = arith.subf %8, %11 : vector<8x8xf32>
    %13 = math.exp %12 : vector<8x8xf32>
    %cst_10 = arith.constant dense<0.000000e+00> : vector<8xf32>
    %14 = vector.multi_reduction <add>, %13, %cst_10 [1] : vector<8x8xf32> to vector<8xf32>
    %15 = vector.shape_cast %14 : vector<8xf32> to vector<8x1xf32>
    %16 = vector.broadcast %15 : vector<8x1xf32> to vector<8x8xf32>
    %17 = arith.divf %13, %16 : vector<8x8xf32>
    %cst_11 = arith.constant dense<0.000000e+00> : vector<8x32xf32>
    %18 = tpu.matmul %17, %7, %cst_11 {dimension_numbers = #tpu.dot_dimension_numbers<[1], [0], [0], [1], [0, 0, 1, 1], [], []>} : vector<8x8xf32>, vector<8x32xf32>, vector<8x32xf32> -> vector<8x32xf32>
    %c0_12 = arith.constant 0 : index
    %c0_13 = arith.constant 0 : index
    %c0_14 = arith.constant 0 : index
    %19 = vector.load %arg5[%c0_12, %c0_13, %c0_14] : memref<1x8x32xf32, #tpu.memory_space<vmem>>, vector<1x8x32xf32>
    %20 = vector.shape_cast %19 : vector<1x8x32xf32> to vector<8x32xf32>
    %21 = vector.shape_cast %18 : vector<8x32xf32> to vector<1x8x32xf32>
    tpu.vector_store %arg5[%c0_12, %c0_13, %c0_14], %21 {strides = array<i32>} : memref<1x8x32xf32, #tpu.memory_space<vmem>>, vector<1x8x32xf32>,
    %c0_15 = arith.constant 0 : index
    %c0_16 = arith.constant 0 : index
    %c0_17 = arith.constant 0 : index
    %22 = vector.load %arg6[%c0_15, %c0_16, %c0_17] : memref<1x8x8xf32, #tpu.memory_space<vmem>>, vector<1x8x8xf32>
    %23 = vector.shape_cast %22 : vector<1x8x8xf32> to vector<8x8xf32>
    %24 = vector.shape_cast %17 : vector<8x8xf32> to vector<1x8x8xf32>
    tpu.vector_store %arg6[%c0_15, %c0_16, %c0_17], %24 {strides = array<i32>} : memref<1x8x8xf32, #tpu.memory_space<vmem>>, vector<1x8x8xf32>,
    return
  }
  func.func @transform_0(%arg0: i32, %arg1: i32) -> (i32, i32, i32) {
    %c0_i32 = arith.constant 0 : i32
    %c0_i32_0 = arith.constant 0 : i32
    return %arg0, %arg1, %c0_i32 : i32, i32, i32
  }
  func.func @transform_1(%arg0: i32, %arg1: i32) -> (i32, i32, i32) {
    %c0_i32 = arith.constant 0 : i32
    %c0_i32_0 = arith.constant 0 : i32
    %c0_i32_1 = arith.constant 0 : i32
    return %arg0, %c0_i32, %c0_i32_0 : i32, i32, i32
  }
  func.func @transform_2(%arg0: i32, %arg1: i32) -> (i32, i32, i32) {
    %c0_i32 = arith.constant 0 : i32
    %c0_i32_0 = arith.constant 0 : i32
    %c0_i32_1 = arith.constant 0 : i32
    return %arg0, %c0_i32, %c0_i32_0 : i32, i32, i32
  }
  func.func @transform_3(%arg0: i32, %arg1: i32) -> (i32, i32, i32) {
    %c0_i32 = arith.constant 0 : i32
    %c0_i32_0 = arith.constant 0 : i32
    return %arg0, %arg1, %c0_i32 : i32, i32, i32
  }
  func.func @transform_4(%arg0: i32, %arg1: i32) -> (i32, i32, i32) {
    %c0_i32 = arith.constant 0 : i32
    %c0_i32_0 = arith.constant 0 : i32
    return %arg0, %arg1, %c0_i32 : i32, i32, i32
  }
}

</mosaic_0001>

<bundles_post_ra>
// kernel: tpu_custom_call.1
= control target key start
LH: loop header
LB: loop body
LE: loop exit
PB: predicated region body
PF: predicated region fallthrough
CT: control target
= control target key end

     0   :  { %s1262_s0 = inlined_call_operand.hbm [shape: f32[4,8,32], index: 0, kind: input, shape index: {}]   ;;  %s1263_s1 = inlined_call_operand.hbm [shape: f32[4,8,32], index: 1, kind: input, shape index: {}]   ;;  %s1264_s2 = inlined_call_operand.hbm [shape: f32[4,8,32], index: 2, kind: input, shape index: {}]   ;;  %s1265_s3 = inlined_call_operand.hbm [shape: f32[4,8,32], index: 3, kind: output, shape index: {0}]   ;;  %s1266_s4 = inlined_call_operand.hbm [shape: f32[4,8,8], index: 4, kind: output, shape index: {1}]  }
   0x1   :  { %1270 = sst [smem:[#allocation18_spill]] %s1263_s1 }
   0x2   :  { %10 = vsyncpa [#allocation3], 0 }
   0x3   :  { %12 = vsyncpa [#allocation3 + $0x1], 0 }
   0x4   :  { %13 = vsyncpa [#allocation6], 0 }
   0x5   :  { %15 = vsyncpa [#allocation6 + $0x1], 0 }
   0x6   :  { %16 = vsyncpa [#allocation4], 0 }
   0x7   :  { %18 = vsyncpa [#allocation4 + $0x1], 0 }
   0x8   :  { %19 = vsyncpa [#allocation10], 0 }
   0x9   :  { %21 = vsyncpa [#allocation10 + $0x1], 0  ;;  %s1026_s15 = smov 0   ;;  %s1028_s16 = smov 0  }
   0xa   :  { %s1030_s17 = smov 0   ;;  %s1032_s18 = smov 0  }
   0xb   :  { %s1034_s19 = smov 0   ;;  %s1036_s20 = smov 0  }
   0xc LB: > { %1271 = sst [smem:[#allocation15_spill]] %s988_s19  ;;  %s1057_s21 = sadd.s32 4294967295, %s992_s20   ;;  %s992_s20 = sphi %s1036_s20, %s27_s20   ;;  %s988_s19 = sphi %s1034_s19, %s1284_s19   ;;  %s984_s18 = sphi %s1032_s18, %s1283_s18   ;;  %s980_s17 = sphi %s1030_s17, %s1287_s17   ;;  %s976_s16 = sphi %s1028_s16, %s1286_s16   ;;  %s972_s15 = sphi %s1026_s15, %s1285_s15  }
   0xd   : > { %s673_s22 = sadd.s32 4294967294, %s992_s20   ;;  %s39_s23 = sadd.s32 1, %s988_s19 }
   0xe   : > { %s48_s24 = sadd.s32 1, %s980_s17  ;;  %p41_p0 = scmp.ge.s32.totalorder %s39_s23, 4 }
   0xf   : > { %p55_p1 = scmp.ne.s32.totalorder %s980_s17, %s976_s16  ;;  %p56_p2 = scmp.eq.s32.totalorder %s992_s20, 0 }
  0x10   : > { %p61_p3 = scmp.ne.s32.totalorder %s976_s16, %s972_s15  ;;  %s1289_s23 = smov (%p41_p0, %s39_s23), 0 }
  0x11   : > { %1272 = sst [smem:[#allocation16_spill]] %s1289_s23  ;;  %p1069_p4 = por %p56_p2, %p55_p1 }
  0x12   : > { %p62_p5 = scmp.eq.s32.totalorder %s1057_s21, 0  ;;  %s43_s26 = ssub.s32 %s988_s19, %s1289_s23 }
  0x13   : > { %p139_p6 = scmp.eq.s32.totalorder %s1057_s21, 3  ;;  %p46_p7 = scmp.eq.s32.totalorder %s43_s26, 0 }
  0x14   : > { %p1077_p8 = por %p62_p5, %p61_p3  ;;  %p145_p10 = scmp.eq.s32.totalorder %s673_s22, 3 }
  0x15   : > { %p1081_p9 = por %p139_p6, %p55_p1  ;;  %p738_p12 = scmp.lt.s32.totalorder %s992_s20, 4 }
  0x16   : > { %s1086_s29 = scalar_select %p46_p7, %s980_s17, %s48_s24  }
  0x17   : > { %p1088_p11 = por %p145_p10, %p61_p3  ;;  %s1267_s5 = sand.u32 1, %s980_s17  }
  0x18   : > { %1276 = sst [smem:[#allocation17_spill]] %s1086_s29  ;;  %s1096_s6 = sshll.u32 %s1267_s5, 3 }
  0x19   : > { %s1099_s7 = sshll.u32 %s988_s19, 7  ;;  %p1103_p13 = pnand %p738_p12, %p1069_p4 }
  0x1a   : > { %s212_s9 = sand.u32 1, %s992_s20   ;;  %s1279_s1 = sld [smem:[#allocation18_spill]] }
  0x1b   : > { %s216_s13 = scalar_lea.vmem [#allocation5], %s1096_s6  ;;  %p682_p0 = scmp.ge.s32.totalorder %s992_s20, 1 }
  0x1c   : > { %s223_s14 = sshll.u32 %s216_s13, 4  ;;  %p246_p1 = scmp.lt.s32.totalorder %s992_s20, 5  ;;  %s224_s14 = int_to_ptr.vmem [resolvable:$true] %s223_s14 }
  0x1d   : > { %s1115_s22 = scalar_lea.sflag [#allocation6], %s212_s9  ;;  %p796_p2 = pneg %p1103_p13 }
  0x1e   : > { %s807_s24 = scalar_lea.vmem %s224_s14, 128  ;;  %s994_s25 = smov [#allocation5]  }
  0x1f   : > { %p808_p3 = scmp.ne.s32.totalorder %s224_s14, %s807_s24  ;;  %s812_s26 = sshll.u32 %s994_s25, 4  ;;  %s813_s26 = int_to_ptr.vmem [resolvable:$false] %s812_s26 }
  0x20   : > { %s221_s12 = scalar_lea.hbm %s1279_s1, %s1099_s7  ;;  %s814_s10 = scalar_lea.vmem %s813_s26, 256 }
  0x21   : > { %p810_p4 = pnand %p808_p3, %p796_p2  ;;  %p815_p6 = scmp.lt.s32.totalorder %s224_s14, %s813_s26 }
  0x22   : > { %p816_p7 = scmp.lt.s32.totalorder %s814_s10, %s807_s24 }
  0x23   : > { %p811_p5 = pneg %p810_p4 }
  0x24   : > { %p817_p10 = por %p816_p7, %p815_p6 }
  0x26   : > { %p818_p12 = pnand %p817_p10, %p811_p5 }
  0x28   : > { %821 = shalt.err (!%p818_p12)
}
  0x29   : > { %727 = dma.hbm_to_vmem [thread:$0]  (!%p1103_p13), %s221_s12, 128, %s224_s14, %s1115_s22  }
  0x2a   : > { %p1129_p3 = pnand %p682_p0, %p246_p1  ;;  %s203_s24 = scalar_lea.hbm %s1262_s0, %s1099_s7 }
  0x2b   : > { %s197_s25 = scalar_lea.vmem [#allocation2], %s1096_s6  ;;  %s239_s1 = scalar_lea.hbm %s1264_s2, %s1099_s7 }
  0x2c   : > { %s205_s26 = sshll.u32 %s197_s25, 4  ;;  %s1281_s23 = sand.u32 1, %s980_s17   ;;  %s206_s26 = int_to_ptr.vmem [resolvable:$true] %s205_s26 }
  0x2d   : > { %s194_s19 = scalar_lea.sflag [#allocation3], %s1281_s23  ;;  %s835_s12 = scalar_lea.vmem %s206_s26, 128 }
  0x2e   : > { %p836_p4 = scmp.ne.s32.totalorder %s206_s26, %s835_s12  ;;  %s995_s14 = smov [#allocation2]  }
  0x2f   : > { %s840_s29 = sshll.u32 %s995_s14, 4  ;;  %s841_s29 = int_to_ptr.vmem [resolvable:$false] %s840_s29 }
  0x30   : > { %p838_p0 = pnand %p836_p4, %p796_p2  ;;  %s842_s11 = scalar_lea.vmem %s841_s29, 256 }
  0x31   : > { %p843_p5 = scmp.lt.s32.totalorder %s206_s26, %s841_s29  ;;  %p844_p6 = scmp.lt.s32.totalorder %s842_s11, %s835_s12 }
  0x32   : > { %p839_p1 = pneg %p838_p0 }
  0x33   : > { %p845_p7 = por %p844_p6, %p843_p5 }
  0x35   : > { %p846_p10 = pnand %p845_p7, %p839_p1 }
  0x37   : > { %849 = shalt.err (!%p846_p10)
}
  0x38   : > { %724 = dma.hbm_to_vmem [thread:$0]  (!%p1103_p13), %s203_s24, 128, %s206_s26, %s194_s19  }
  0x39   : > { %s234_s23 = scalar_lea.vmem [#allocation7], %s1096_s6  ;;  %s996_s25 = smov [#allocation7]  }
  0x3a   : > { %s241_s5 = sshll.u32 %s234_s23, 4  ;;  %s868_s29 = sshll.u32 %s996_s25, 4  ;;  %s242_s5 = int_to_ptr.vmem [resolvable:$true] %s241_s5  ;;  %s869_s29 = int_to_ptr.vmem [resolvable:$false] %s868_s29 }
  0x3b   : > { %s863_s13 = scalar_lea.vmem %s242_s5, 128  ;;  %s870_s10 = scalar_lea.vmem %s869_s29, 256 }
  0x3c   : > { %p864_p12 = scmp.ne.s32.totalorder %s242_s5, %s863_s13  ;;  %p871_p1 = scmp.lt.s32.totalorder %s242_s5, %s869_s29 }
  0x3d   : > { %p872_p5 = scmp.lt.s32.totalorder %s870_s10, %s863_s13 }
  0x3e   : > { %p866_p4 = pnand %p864_p12, %p796_p2 }
  0x3f   : > { %p873_p6 = por %p872_p5, %p871_p1 }
  0x40   : > { %p867_p0 = pneg %p866_p4 }
  0x42   : > { %p874_p7 = pnand %p873_p6, %p867_p0 }
  0x44   : > { %877 = shalt.err (!%p874_p7)
}
  0x45   : > { %730 = dma.hbm_to_vmem [thread:$0]  (!%p1103_p13), %s239_s1, 128, %s242_s5, %s1115_s22  }
  0x46   : > { %250 = sbr.rel (%p1129_p3) target bundleno = 797 (0x31d), region = 32  ;;  %s1164_s24 = sand.u32 (!%p1129_p3), 1, %s976_s16  }
  0x47   : > { %s1167_s26 = sshll.u32 (!%p1129_p3), %s1164_s24, 3  ;;  %s253_s8 = scalar_lea.sflag (!%p1129_p3), [#allocation3], %s1164_s24 }
  0x48   : > { %s256_s12 = scalar_lea.vmem (!%p1129_p3), [#allocation2], %s1167_s26 }
  0x4b   : > { %955 = dma.done.wait (%p1077_p8), %s253_s8, 128  }
  0x4c   : > { %957 = vsyncadd (%p1077_p8), %s253_s8, 4294967168  ;;  %s261_s1 = sand.u32 1, %s1057_s21   ;;  %s265_s22 = scalar_lea.vmem [#allocation5], %s1167_s26 }
  0x4d   : > { %s262_s7 = scalar_lea.sflag [#allocation6], %s261_s1 }
  0x4e   : > { %959 = dma.done.wait (%p1077_p8), %s262_s7, 256  }
  0x4f   : > { %961 = vsyncadd (%p1077_p8), %s262_s7, 4294967040  ;;  %v997_v0 = vmov 0.0   ;;  %vm998_vm0 = vmmov 0   ;;  %vm318_vm1 = vcmask 261120   ;;  %v316_v1 = vld [vmem:[%s265_s22] sm:$0xff]  ;;  %v314_v2 = vld [vmem:[%s256_s12] sm:$0xff] }
  0x50   : > { %701 = vmatprep.subr.mxu0 %v997_v0  ;;  %703 = vmatprep.mubr.msk.f32.mxu0 %vm998_vm0, %v997_v0  ;;  %v315_v3 = vmul.f32 0.17677669, %v314_v2  ;;  %vm395_vm2 = vcmask 64512   ;;  %s274_s21 = scalar_lea.vmem [#allocation7], %s1167_s26  ;;  %s313_s27 = scalar_lea.vmem [#allocation9], %s1167_s26 }
  0x51   : > { %706 = vmatprep.subr.mxu1 %v997_v0  ;;  %708 = vmatprep.mubr.msk.f32.mxu1 %vm998_vm0, %v997_v0  ;;  %v317_v12 = vld [vmem:[%s274_s21] sm:$0xff]  ;;  %s693_s9 = sshll.u32 %s984_s18, 7  ;;  %s516_s5 = sshll.u32 %s313_s27, 4  ;;  %s517_s5 = int_to_ptr.vmem [resolvable:$true] %s516_s5 }
  0x52   : > { %702 = vmatpush3.xpose.msk.msra.mxu0 %vm318_vm1, %v316_v1  ;;  %707 = vmatpush3.msra.mxu1 %v317_v12  ;;  %s514_s23 = scalar_lea.hbm %s1266_s4, %s693_s9  ;;  %s488_s13 = scalar_lea.sflag [#allocation10], %s1164_s24 }
  0x53   : > { %s878_s25 = scalar_lea.vmem %s517_s5, 128  ;;  %s999_s29 = smov [#allocation9]  }
  0x54   : > { %p879_p8 = scmp.ne.s32.totalorder %s517_s5, %s878_s25  ;;  %s882_s10 = sshll.u32 %s999_s29, 4  ;;  %s883_s10 = int_to_ptr.vmem [resolvable:$false] %s882_s10 }
  0x55   : > { %704 = vmatmul.mubr.msk.f32.vlgmr.msra.gmra.mxu0 %vm318_vm1, %v315_v3  ;;  %s884_s19 = scalar_lea.vmem %s883_s10, 256  ;;  %p885_p3 = scmp.lt.s32.totalorder %s517_s5, %s883_s10 }
  0x56   : > { %p880_p13 = pnand %p879_p8, %p1081_p9  ;;  %p886_p10 = scmp.lt.s32.totalorder %s884_s19, %s878_s25 }
  0x58   : > { %p881_p2 = pneg %p880_p13  ;;  %p887_p12 = por %p886_p10, %p885_p3 }
  0x5a   : > { %p888_p4 = pnand %p887_p12, %p881_p2 }
 0x115   : > { %v391_v4 = vpop.f32.mrf.mxu0 }
 0x116   : > { %v396_v5 = vsel %vm395_vm2, %v391_v4, -inf }
 0x117   : > { %397 = vmax.xlane.f32.xlu0 %v396_v5  ;;  %v705_v6 = vpop.f32.mrf.mxu0 }
 0x1a0   : > { %v398_v7 = vpop.xlane.xlu0 %397 }
 0x1a1   : > { %v399_v8 = vsub.f32 %v391_v4, %v398_v7 }
 0x1a3   : > { %v400_v9 = vmul.f32 1.442695, %v399_v8 }
 0x1a5   : > { %790 = vpow2.f32 %v400_v9 }
 0x1b2   : > { %v791_v10 = vpop.eup %790 }
 0x1b3   : > { %v402_v11 = vsel %vm395_vm2, %v791_v10, 0.0 }
 0x1b4   : > { %403 = vadd.xlane.f32.xlu0 %v402_v11 }
 0x23d   : > { %v404_v13 = vpop.xlane.xlu0 %403 }
 0x23e   : > { %792 = vrcp.f32 %v404_v13 }
 0x24b   : > { %v793_v14 = vpop.eup %792 }
 0x24c   : > { %v406_v15 = vmul.f32 %v793_v14, %v791_v10 }
 0x24e   : > { %709 = vmatmul.mubr.msk.f32.vlgmr.msra.gmra.mxu1 %vm395_vm2, %v406_v15  ;;  %481 = vst.msk [vmem:[%s313_s27] sm:$0xff] %vm395_vm2, %v406_v15 }
 0x24f   : > { %891 = shalt.err (!%p888_p4)
}
 0x250   : > { %s892_s6 = scalar_lea.hbm %s514_s23, 128  ;;  %s896_s1 = scalar_lea.hbm %s1266_s4, 512 }
 0x251   : > { %p893_p0 = scmp.ne.s32.totalorder %s514_s23, %s892_s6  ;;  %p897_p6 = scmp.lt.s32.totalorder %s514_s23, %s1266_s4 }
 0x252   : > { %p898_p7 = scmp.lt.s32.totalorder %s896_s1, %s892_s6 }
 0x253   : > { %p894_p1 = pnand %p893_p0, %p1081_p9 }
 0x254   : > { %p899_p8 = por %p898_p7, %p897_p6 }
 0x255   : > { %p895_p5 = pneg %p894_p1 }
 0x257   : > { %p900_p13 = pnand %p899_p8, %p895_p5 }
 0x259   : > { %903 = shalt.err (!%p900_p13)
}
 0x25a   : > { %718 = dma.vmem_to_hbm [thread:$0]  (%p1081_p9), %s517_s5, 128, %s514_s23, %s488_s13  }
 0x25b   : > { %s306_s21 = scalar_lea.vmem [#allocation8], %s1167_s26  ;;  %s1214_s25 = scalar_lea.hbm %s1265_s3, %s693_s9 }
 0x25c   : > { %s502_s27 = sshll.u32 %s306_s21, 4  ;;  %s483_s29 = scalar_lea.sflag [#allocation4], %s1164_s24  ;;  %s1216_s27 = int_to_ptr.vmem [resolvable:$true] %s502_s27 }
 0x25d   : > { %s904_s10 = scalar_lea.vmem %s1216_s27, 128  ;;  %s1000_s18 = smov [#allocation8]  }
 0x25e   : > { %p905_p2 = scmp.ne.s32.totalorder %s1216_s27, %s904_s10  ;;  %s908_s26 = sshll.u32 %s1000_s18, 4  ;;  %s909_s26 = int_to_ptr.vmem [resolvable:$false] %s908_s26 }
 0x25f   : > { %s910_s9 = scalar_lea.vmem %s909_s26, 256  ;;  %p911_p12 = scmp.lt.s32.totalorder %s1216_s27, %s909_s26 }
 0x260   : > { %p906_p3 = pnand %p905_p2, %p1081_p9  ;;  %p912_p4 = scmp.lt.s32.totalorder %s910_s9, %s904_s10 }
 0x262   : > { %p907_p10 = pneg %p906_p3  ;;  %p913_p0 = por %p912_p4, %p911_p12 }
 0x264   : > { %p914_p1 = pnand %p913_p0, %p907_p10 }
 0x30e   : > { %v476_v16 = vpop.f32.mrf.mxu1 }
 0x30f   : > { %480 = vst.msk [vmem:[%s306_s21] sm:$0xff] %vm318_vm1, %v476_v16 }
 0x310   : > { %v710_v17 = vpop.f32.mrf.mxu1 }
 0x311   : > { %917 = shalt.err (!%p914_p1)
}
 0x312   : > { %s918_s23 = scalar_lea.hbm %s1214_s25, 128  ;;  %s922_s13 = scalar_lea.hbm %s1265_s3, 512 }
 0x313   : > { %p919_p5 = scmp.ne.s32.totalorder %s1214_s25, %s918_s23  ;;  %p923_p8 = scmp.lt.s32.totalorder %s1214_s25, %s1265_s3 }
 0x314   : > { %p924_p13 = scmp.lt.s32.totalorder %s922_s13, %s918_s23 }
 0x315   : > { %p920_p6 = pnand %p919_p5, %p1081_p9 }
 0x316   : > { %p925_p2 = por %p924_p13, %p923_p8 }
 0x317   : > { %p921_p7 = pneg %p920_p6 }
 0x319   : > { %p926_p3 = pnand %p925_p2, %p921_p7 }
 0x31b   : > { %929 = shalt.err (!%p926_p3)
}
 0x31c   : > { %717 = dma.vmem_to_hbm [thread:$0]  (%p1081_p9), %s1216_s27, 128, %s1214_s25, %s483_s29  }
 0x31d PF: > { %p739_p10 = scmp.ge.s32.totalorder %s992_s20, 2  ;;  %s528_s8 = sand.u32 1, %s972_s15  }
 0x31e   : > { %s529_s12 = scalar_lea.sflag [#allocation4], %s528_s8 }
 0x31f   : > { %p732_p12 = pnand %p739_p10, %p1088_p11 }
 0x321   : > { %p733_p4 = pneg %p732_p12 }
 0x323   : > { %963 = dma.done.wait (%p733_p4), %s529_s12, 128  }
 0x324   : > { %965 = vsyncadd (%p733_p4), %s529_s12, 4294967168  ;;  %s538_s1 = scalar_lea.sflag [#allocation10], %s528_s8 }
 0x325   : > { %967 = dma.done.wait (%p733_p4), %s538_s1, 128  }
 0x326   : > { %969 = vsyncadd (%p733_p4), %s538_s1, 4294967168  ;;  %s27_s20 = sadd.s32 1, %s992_s20   ;;  %s1282_s28 = sld [smem:[#allocation17_spill]] }
 0x327   : > { %p24_p0 = scmp.ge.s32.totalorder %s27_s20, 6   ;;  %s1283_s18 = sld [smem:[#allocation15_spill]] }
 0x328   : > { %s1284_s19 = sld [smem:[#allocation16_spill]]  ;;  %s1285_s15 = smov %s976_s16 }
 0x329   : > { %s1286_s16 = smov %s980_s17  ;;  %26 = sbr.rel (!%p24_p0) target bundleno = 12 (0xc), region = 118 }
 0x32c   : > { %s1287_s17 = smov %s1282_s28 }
 0x32e   :  { %543 = vsyncpa [#allocation3], 1 }
 0x32f   :  { %545 = vsyncpa [#allocation3 + $0x1], 1 }
 0x330   :  { %546 = vsyncpa [#allocation6], 1 }
 0x331   :  { %548 = vsyncpa [#allocation6 + $0x1], 1 }
 0x332   :  { %549 = vsyncpa [#allocation4], 1 }
 0x333   :  { %551 = vsyncpa [#allocation4 + $0x1], 1 }
 0x334   :  { %552 = vsyncpa [#allocation10], 1 }
 0x335   :  { %554 = vsyncpa [#allocation10 + $0x1], 1 }

</bundles_post_ra>
